<compile_context>
chip_gen: v7x
topology: tpu7x:2x2x1
jax: 0.10.0
libtpu: 0.0.40
codegen_flags: <defaults>
</compile_context>

<pallas_src>
import functools

import jax
import jax.numpy as jnp
from jax import lax
from jax.experimental import pallas as pl
from jax.experimental.pallas import tpu as pltpu

EPS = 1e-6  # BERT-pytorch LayerNorm eps (added to std, NOT to variance)

# Murmur3 fmix32-style constants, written as wrapped int32 (two's complement).
_MIX_SEED = -1640531527   # 0x9E3779B9
_MIX_A = -2048144789      # 0x85EBCA6B
_MIX_B = -1028477387      # 0xC2B2AE35
_MASK31 = 0x7FFFFFFF


def _pick_tile_rows(n, target):
    """Largest row tile <= target that is a multiple of 8 and divides n
    (or the full n, which is always a legal block)."""
    if n <= target:
        return n
    t = (min(target, n) // 8) * 8
    while t >= 8:
        if n % t == 0:
            return t
        t -= 8
    return n


def _keep_threshold(keep_prob):
    return min(int(round(keep_prob * 2.0 ** 31)), 2 ** 31 - 1)


def _keep_mask(flat_idx_i32, seed_i32, keep_threshold):
    """keep iff hash31(flat_idx, seed) < keep_threshold  (P[keep] ~= thr/2^31).

    Pure int32 elementwise ops -> works in Mosaic and interpret mode.
    Depends only on the *global* element index and the seed, never on the
    tiling, so the dropout pattern is reproducible across tile sizes and
    across the fused / unfused paths.
    """
    seed_i32 = jnp.asarray(seed_i32, dtype=jnp.int32)
    h = flat_idx_i32 ^ (seed_i32 * jnp.int32(_MIX_SEED))
    h = h ^ (h >> 16)
    h = h * jnp.int32(_MIX_A)
    h = h ^ (h >> 13)
    h = h * jnp.int32(_MIX_B)
    h = h ^ (h >> 16)
    return (h & _MASK31) < keep_threshold


# ---------------------------------------------------------------------------
# Kernel 1: LayerNorm (torch semantics: mean / unbiased std over last dim,
#           y = a_2 * (x - mean) / (std + eps) + b_2)
# ---------------------------------------------------------------------------
def layernorm_kernel(x_ref, g_ref, b_ref, o_ref):
    x = x_ref[...].astype(jnp.float32)
    h = x.shape[-1]
    mean = jnp.mean(x, axis=-1, keepdims=True)
    diff = x - mean
    # torch.Tensor.std is unbiased (divides by H-1); eps is added to std.
    var_unbiased = jnp.sum(diff * diff, axis=-1, keepdims=True) / (h - 1)
    inv = 1.0 / (jnp.sqrt(var_unbiased) + EPS)          # per-row (1/H the divides)
    y = diff * inv * g_ref[...] + b_ref[...]
    o_ref[...] = y.astype(o_ref.dtype)


def layer_norm_pallas(x2d, gamma, beta, *, target_tile_rows=512):
    n, h = x2d.shape
    tr = _pick_tile_rows(n, target_tile_rows)
    assert n % tr == 0
    g2 = gamma.reshape(1, h).astype(jnp.float32)
    b2 = beta.reshape(1, h).astype(jnp.float32)
    return pl.pallas_call(
        layernorm_kernel,
        out_shape=jax.ShapeDtypeStruct((n, h), x2d.dtype),
        grid=(n // tr,),
        in_specs=[
            pl.BlockSpec((tr, h), lambda i: (i, 0)),
            pl.BlockSpec((1, h), lambda i: (0, 0)),
            pl.BlockSpec((1, h), lambda i: (0, 0)),
        ],
        out_specs=pl.BlockSpec((tr, h), lambda i: (i, 0)),
        compiler_params=pltpu.CompilerParams(dimension_semantics=("parallel",)),
    )(x2d, g2, b2)


# ---------------------------------------------------------------------------
# Kernel 2: fused dropout (keep w.p. 1-p, scale by 1/(1-p)) + residual add:
#           out = x + dropout(y)
# ---------------------------------------------------------------------------
def dropout_residual_kernel(seed_ref, x_ref, y_ref, o_ref, *,
                            keep_threshold, scale, apply_dropout):
    x = x_ref[...].astype(jnp.float32)
    y = y_ref[...].astype(jnp.float32)
    if apply_dropout:
        tr, h = y_ref.shape
        row0 = pl.program_id(0) * tr
        rows = lax.broadcasted_iota(jnp.int32, (tr, h), 0) + row0
        cols = lax.broadcasted_iota(jnp.int32, (tr, h), 1)
        keep = _keep_mask(rows * h + cols, seed_ref[0], keep_threshold)
        y = jnp.where(keep, y * scale, 0.0)
    o_ref[...] = (x + y).astype(o_ref.dtype)


def dropout_residual_pallas(x2d, y2d, seed, p, *, target_tile_rows=512):
    n, h = x2d.shape
    tr = _pick_tile_rows(n, target_tile_rows)
    assert n % tr == 0
    keep_prob = 1.0 - float(p)
    apply_dropout = float(p) > 0.0
    kern = functools.partial(
        dropout_residual_kernel,
        keep_threshold=_keep_threshold(keep_prob),
        scale=(1.0 / keep_prob) if apply_dropout else 1.0,
        apply_dropout=apply_dropout,
    )
    grid_spec = pltpu.PrefetchScalarGridSpec(
        num_scalar_prefetch=1,
        grid=(n // tr,),
        in_specs=[
            pl.BlockSpec((tr, h), lambda i, s: (i, 0)),
            pl.BlockSpec((tr, h), lambda i, s: (i, 0)),
        ],
        out_specs=pl.BlockSpec((tr, h), lambda i, s: (i, 0)),
    )
    return pl.pallas_call(
        kern,
        out_shape=jax.ShapeDtypeStruct((n, h), x2d.dtype),
        grid_spec=grid_spec,
        compiler_params=pltpu.CompilerParams(dimension_semantics=("parallel",)),
    )(jnp.asarray([seed], dtype=jnp.int32), x2d, y2d)


# ---------------------------------------------------------------------------
# Kernel 3 (fused path for linear sublayers):
#   out = x + dropout(LayerNorm(x) @ W + bias)   in a single kernel.
# Removes the two HBM round-trips of the normed / sublayer activations.
# W and bias use constant block indices, so they stay resident in VMEM
# across row tiles (fits for typical BERT hidden sizes).
# ---------------------------------------------------------------------------
def fused_ln_linear_dropres_kernel(seed_ref, x_ref, g_ref, b_ref, w_ref,
                                   bias_ref, o_ref, *,
                                   keep_threshold, scale, apply_dropout):
    x = x_ref[...].astype(jnp.float32)
    h_in = x.shape[-1]
    mean = jnp.mean(x, axis=-1, keepdims=True)
    diff = x - mean
    var_unbiased = jnp.sum(diff * diff, axis=-1, keepdims=True) / (h_in - 1)
    inv = 1.0 / (jnp.sqrt(var_unbiased) + EPS)
    normed = diff * inv * g_ref[...] + b_ref[...]
    y = jnp.dot(normed, w_ref[...].astype(jnp.float32),
                preferred_element_type=jnp.float32) + bias_ref[...]
    if apply_dropout:
        tr, h_out = y.shape
        row0 = pl.program_id(0) * tr
        rows = lax.broadcasted_iota(jnp.int32, (tr, h_out), 0) + row0
        cols = lax.broadcasted_iota(jnp.int32, (tr, h_out), 1)
        keep = _keep_mask(rows * h_out + cols, seed_ref[0], keep_threshold)
        y = jnp.where(keep, y * scale, 0.0)
    o_ref[...] = (x + y).astype(o_ref.dtype)


def sublayer_connection_fused_linear(x, w, b, gamma, beta, *, dropout_p, seed,
                                     target_tile_rows=256):
    bsz, s, h = x.shape
    h_out = w.shape[1]
    assert w.shape[0] == h and h_out == h, "residual needs matching widths"
    n = bsz * s
    x2d = x.reshape(n, h)
    tr = _pick_tile_rows(n, target_tile_rows)
    assert n % tr == 0
    keep_prob = 1.0 - float(dropout_p)
    apply_dropout = float(dropout_p) > 0.0
    kern = functools.partial(
        fused_ln_linear_dropres_kernel,
        keep_threshold=_keep_threshold(keep_prob),
        scale=(1.0 / keep_prob) if apply_dropout else 1.0,
        apply_dropout=apply_dropout,
    )
    grid_spec = pltpu.PrefetchScalarGridSpec(
        num_scalar_prefetch=1,
        grid=(n // tr,),
        in_specs=[
            pl.BlockSpec((tr, h), lambda i, s_: (i, 0)),
            pl.BlockSpec((1, h), lambda i, s_: (0, 0)),
            pl.BlockSpec((1, h), lambda i, s_: (0, 0)),
            pl.BlockSpec((h, h_out), lambda i, s_: (0, 0)),   # resident weight
            pl.BlockSpec((1, h_out), lambda i, s_: (0, 0)),
        ],
        out_specs=pl.BlockSpec((tr, h_out), lambda i, s_: (i, 0)),
    )
    out2d = pl.pallas_call(
        kern,
        out_shape=jax.ShapeDtypeStruct((n, h_out), x.dtype),
        grid_spec=grid_spec,
        compiler_params=pltpu.CompilerParams(dimension_semantics=("parallel",)),
    )(jnp.asarray([seed], dtype=jnp.int32), x2d,
      gamma.reshape(1, h).astype(jnp.float32),
      beta.reshape(1, h).astype(jnp.float32),
      w, b.reshape(1, h_out))
    return out2d.reshape(bsz, s, h_out)


# ---------------------------------------------------------------------------
# General SublayerConnection forward: x + dropout(sublayer(norm(x)))
# `sublayer` is an arbitrary JAX callable (as in the PyTorch module).
# ---------------------------------------------------------------------------
def sublayer_connection(x, sublayer, gamma, beta, *, dropout_p, seed):
    bsz, s, h = x.shape
    x2d = x.reshape(bsz * s, h)
    normed = layer_norm_pallas(x2d, gamma, beta)
    sub_out = sublayer(normed.reshape(bsz, s, h)).reshape(bsz * s, h)
    out2d = dropout_residual_pallas(x2d, sub_out, seed, dropout_p)
    return out2d.reshape(bsz, s, h)


# ---------------------------------------------------------------------------
# Pure-JAX reference (same hash-based dropout mask) for validation.
# ---------------------------------------------------------------------------
def sublayer_connection_reference(x, w, b, gamma, beta, *, dropout_p, seed):
    bsz, s, h = x.shape
    x2d = x.reshape(bsz * s, h).astype(jnp.float32)
    mean = jnp.mean(x2d, axis=-1, keepdims=True)
    diff = x2d - mean
    var_unbiased = jnp.sum(diff * diff, axis=-1, keepdims=True) / (h - 1)
    std = jnp.sqrt(var_unbiased)
    normed = gamma * diff / (std + EPS) + beta
    y = normed @ w + b
    if float(dropout_p) > 0.0:
        n, h_out = y.shape
        keep_prob = 1.0 - float(dropout_p)
        rows = jnp.arange(n, dtype=jnp.int32)[:, None]
        cols = jnp.arange(h_out, dtype=jnp.int32)[None, :]
        keep = _keep_mask(rows * h_out + cols, jnp.int32(seed),
                          _keep_threshold(keep_prob))
        y = jnp.where(keep, y * (1.0 / keep_prob), 0.0)
    return (x2d + y).reshape(bsz, s, h)


if __name__ == "__main__":
    B, S, H = 2, 8, 32    # NOTE: production H should be a multiple of 128 for lane-dense stores
    DROPOUT_P = 0.1
    SEED = 1234

    key = jax.random.PRNGKey(0)
    kx, kw = jax.random.split(key)

    x = jax.random.normal(kx, (B, S, H), dtype=jnp.float32)

    # LayerNorm params (default init: a_2 = ones, b_2 = zeros)
    gamma = jnp.ones((H,), dtype=jnp.float32)
    beta = jnp.zeros((H,), dtype=jnp.float32)

    # Deterministic synthetic "sublayer": a simple linear map.
    w_sub = jax.random.normal(kw, (H, H), dtype=jnp.float32) * 0.02
    b_sub = jnp.zeros((H,), dtype=jnp.float32)

    def sublayer(z):
        return jnp.dot(z, w_sub) + b_sub

    out_general = sublayer_connection(x, sublayer, gamma, beta,
                                      dropout_p=DROPOUT_P, seed=SEED)
    out_fused = sublayer_connection_fused_linear(x, w_sub, b_sub, gamma, beta,
                                                 dropout_p=DROPOUT_P, seed=SEED)
    jax.block_until_ready((out_general, out_fused))

    ref = sublayer_connection_reference(x, w_sub, b_sub, gamma, beta,
                                        dropout_p=DROPOUT_P, seed=SEED)

    assert out_general.shape == (B, S, H) and out_general.dtype == jnp.float32
    assert out_fused.shape == (B, S, H) and out_fused.dtype == jnp.float32
    assert bool(jnp.allclose(out_general, ref, rtol=2e-2, atol=2e-2))
    assert bool(jnp.allclose(out_fused, ref, rtol=2e-2, atol=2e-2))
    assert bool(jnp.allclose(out_general, out_fused, rtol=2e-2, atol=2e-2))
    print("KERNEL_OK")
</pallas_src>

<mosaic_0001>
module attributes {stable_mosaic.version = 11 : i64} {
  func.func @layernorm_kernel(%arg0: i32, %arg1: memref<16x32xf32, #tpu.memory_space<vmem>>, %arg2: memref<1x32xf32, #tpu.memory_space<vmem>>, %arg3: memref<1x32xf32, #tpu.memory_space<vmem>>, %arg4: memref<16x32xf32, #tpu.memory_space<vmem>>) attributes {dimension_semantics = [#tpu.dimension_semantics<parallel>], iteration_bounds = array<i64: 1>, scalar_prefetch = 0 : i64, scratch_operands = 0 : i64, tpu.core_type = #tpu.core_type<tc>, window_params = [{transform_indices = @transform_0, window_bounds = array<i64: 16, 32>}, {pipeline_mode = #tpu.pipeline_mode<synchronous>, transform_indices = @transform_1, window_bounds = array<i64: 1, 32>}, {pipeline_mode = #tpu.pipeline_mode<synchronous>, transform_indices = @transform_2, window_bounds = array<i64: 1, 32>}, {transform_indices = @transform_3, window_bounds = array<i64: 16, 32>}]} {
    %c0 = arith.constant 0 : index
    %c0_0 = arith.constant 0 : index
    %0 = vector.load %arg1[%c0, %c0_0] : memref<16x32xf32, #tpu.memory_space<vmem>>, vector<16x32xf32>
    %cst = arith.constant dense<0.000000e+00> : vector<16xf32>
    %1 = vector.multi_reduction <add>, %0, %cst [1] : vector<16x32xf32> to vector<16xf32>
    %2 = vector.shape_cast %1 : vector<16xf32> to vector<16x1xf32>
    %cst_1 = arith.constant 3.200000e+01 : f32
    %3 = vector.broadcast %cst_1 : f32 to vector<16x1xf32>
    %4 = arith.divf %2, %3 : vector<16x1xf32>
    %5 = vector.broadcast %4 : vector<16x1xf32> to vector<16x32xf32>
    %6 = arith.subf %0, %5 : vector<16x32xf32>
    %7 = arith.mulf %6, %6 : vector<16x32xf32>
    %cst_2 = arith.constant dense<0.000000e+00> : vector<16xf32>
    %8 = vector.multi_reduction <add>, %7, %cst_2 [1] : vector<16x32xf32> to vector<16xf32>
    %9 = vector.shape_cast %8 : vector<16xf32> to vector<16x1xf32>
    %cst_3 = arith.constant 3.100000e+01 : f32
    %10 = vector.broadcast %cst_3 : f32 to vector<16x1xf32>
    %11 = arith.divf %9, %10 : vector<16x1xf32>
    %12 = math.sqrt %11 : vector<16x1xf32>
    %cst_4 = arith.constant 9.99999997E-7 : f32
    %13 = vector.broadcast %cst_4 : f32 to vector<16x1xf32>
    %14 = arith.addf %12, %13 : vector<16x1xf32>
    %cst_5 = arith.constant 1.000000e+00 : f32
    %15 = vector.broadcast %cst_5 : f32 to vector<16x1xf32>
    %16 = arith.divf %15, %14 : vector<16x1xf32>
    %17 = vector.broadcast %16 : vector<16x1xf32> to vector<16x32xf32>
    %18 = arith.mulf %6, %17 : vector<16x32xf32>
    %c0_6 = arith.constant 0 : index
    %c0_7 = arith.constant 0 : index
    %19 = vector.load %arg2[%c0_6, %c0_7] : memref<1x32xf32, #tpu.memory_space<vmem>>, vector<1x32xf32>
    %20 = vector.broadcast %19 : vector<1x32xf32> to vector<16x32xf32>
    %21 = arith.mulf %18, %20 : vector<16x32xf32>
    %c0_8 = arith.constant 0 : index
    %c0_9 = arith.constant 0 : index
    %22 = vector.load %arg3[%c0_8, %c0_9] : memref<1x32xf32, #tpu.memory_space<vmem>>, vector<1x32xf32>
    %23 = vector.broadcast %22 : vector<1x32xf32> to vector<16x32xf32>
    %24 = arith.addf %21, %23 : vector<16x32xf32>
    %c0_10 = arith.constant 0 : index
    %c0_11 = arith.constant 0 : index
    %25 = vector.load %arg4[%c0_10, %c0_11] : memref<16x32xf32, #tpu.memory_space<vmem>>, vector<16x32xf32>
    tpu.vector_store %arg4[%c0_10, %c0_11], %24 {strides = array<i32>} : memref<16x32xf32, #tpu.memory_space<vmem>>, vector<16x32xf32>,
    return
  }
  func.func @transform_0(%arg0: i32) -> (i32, i32) {
    %c0_i32 = arith.constant 0 : i32
    %c0_i32_0 = arith.constant 0 : i32
    return %arg0, %c0_i32 : i32, i32
  }
  func.func @transform_1(%arg0: i32) -> (i32, i32) {
    %c0_i32 = arith.constant 0 : i32
    %c0_i32_0 = arith.constant 0 : i32
    %c0_i32_1 = arith.constant 0 : i32
    return %c0_i32, %c0_i32_0 : i32, i32
  }
  func.func @transform_2(%arg0: i32) -> (i32, i32) {
    %c0_i32 = arith.constant 0 : i32
    %c0_i32_0 = arith.constant 0 : i32
    %c0_i32_1 = arith.constant 0 : i32
    return %c0_i32, %c0_i32_0 : i32, i32
  }
  func.func @transform_3(%arg0: i32) -> (i32, i32) {
    %c0_i32 = arith.constant 0 : i32
    %c0_i32_0 = arith.constant 0 : i32
    return %arg0, %c0_i32 : i32, i32
  }
}

</mosaic_0001>

<bundles_post_ra>
// kernel: tpu_custom_call.1
= control target key start
LH: loop header
LB: loop body
LE: loop exit
PB: predicated region body
PF: predicated region fallthrough
CT: control target
= control target key end

     0   :  { %8 = vsyncpa [#allocation3], 0  ;;  %s241_s0 = inlined_call_operand.hbm [shape: f32[16,32], index: 0, kind: input, shape index: {}]   ;;  %s242_s1 = inlined_call_operand.vmem [shape: f32[1,32], index: 1, kind: input, shape index: {}]   ;;  %s243_s2 = inlined_call_operand.vmem [shape: f32[1,32], index: 2, kind: input, shape index: {}]   ;;  %s244_s3 = inlined_call_operand.hbm [shape: f32[16,32], index: 3, kind: output, shape index: {}]  }
   0x1   :  { %9 = vsyncpa [#allocation4], 0  ;;  %s175_s12 = smov [#allocation2]   ;;  %s127_s16 = scalar_lea.hbm %s241_s0, 256 }
   0x2   :  { %s15_s13 = sshll.u32 %s175_s12, 4  ;;  %p128_p0 = scmp.ne.s32.totalorder %s241_s0, %s127_s16  ;;  %s16_s13 = int_to_ptr.vmem [resolvable:$true] %s15_s13 }
   0x3   :  { %p131_p1 = scmp.lt.u32.totalorder %s127_s16, %s241_s0 }
   0x5   :  { %p133_p2 = pnand %p131_p1, %p128_p0 }
   0x7   :  { %136 = shalt.err (!%p133_p2)
}
   0x8   :  { %s137_s21 = scalar_lea.vmem %s16_s13, 256  ;;  %p142_p4 = scmp.lt.s32.totalorder %s16_s13, %s16_s13 }
   0x9   :  { %p138_p3 = scmp.ne.s32.totalorder %s16_s13, %s137_s21  ;;  %p143_p5 = scmp.lt.s32.totalorder %s137_s21, %s137_s21 }
   0xb   :  { %p144_p6 = por %p143_p5, %p142_p4 }
   0xd   :  { %p145_p7 = pnand %p144_p6, %p138_p3 }
   0xf   :  { %148 = shalt.err (!%p145_p7)
}
  0x10   :  { %s176_s22 = smov 128   ;;  %s177_s23 = smov 8  }
  0x11   :  { %21 = dma.hbm_to_vmem [thread:$0]  %s241_s0, 256, %s16_s13, [#allocation3], %s176_s22, %s176_s22, %s177_s23  }
  0x12   :  { %171 = dma.done.wait [#allocation3], 256  }
  0x13   :  { %172 = vsyncadd [#allocation3], 4294967040  ;;  %vm31_vm0 = vcmask 261120   ;;  %v29_v0 = vld [vmem:[#allocation2] sm:$0xff]  ;;  %v30_v1 = vld [vmem:[#allocation2 + $0x8] sm:$0xff]  ;;  %s178_s29 = smov [#allocation5]  }
  0x14   :  { %v32_v2 = vsel %vm31_vm0, %v29_v0, 0.0  ;;  %v35_v3 = vsel %vm31_vm0, %v30_v1, 0.0  ;;  %v113_v31 = vld [vmem:[%s242_s1] ss:$0 sm:$0xff]  ;;  %s101_s30 = sshll.u32 %s178_s29, 4  ;;  %s102_s30 = int_to_ptr.vmem [resolvable:$true] %s101_s30 }
  0x15   :  { %33 = vadd.xlane.f32.xlu0 %v32_v2  ;;  %v114_v33 = vld [vmem:[%s243_s2] ss:$0 sm:$0xff]  ;;  %s149_s4 = scalar_lea.vmem %s102_s30, 256  ;;  %p154_p9 = scmp.lt.s32.totalorder %s102_s30, %s102_s30 }
  0x16   :  { %p150_p8 = scmp.ne.s32.totalorder %s102_s30, %s149_s4  ;;  %p155_p10 = scmp.lt.s32.totalorder %s149_s4, %s149_s4 }
  0x18   :  { %p156_p11 = por %p155_p10, %p154_p9 }
  0x19   :  { %36 = vadd.xlane.f32.xlu0 %v35_v3 }
  0x1a   :  { %p157_p12 = pnand %p156_p11, %p150_p8 }
  0xa2   :  { %v34_v4 = vpop.xlane.xlu0 %33 }
  0xa3   :  { %v39_v5 = vmul.f32 0.03125, %v34_v4 }
  0xa5   :  { %v41_v6 = vsub.f32 %v29_v0, %v39_v5 }
  0xa6   :  { %v37_v7 = vpop.xlane.xlu0 %36 }
  0xa7   :  { %v40_v8 = vmul.f32 0.03125, %v37_v7  ;;  %v43_v9 = vmul.f32 %v41_v6, %v41_v6 }
  0xa9   :  { %v42_v10 = vsub.f32 %v30_v1, %v40_v8  ;;  %v45_v11 = vsel %vm31_vm0, %v43_v9, 0.0 }
  0xaa   :  { %46 = vadd.xlane.f32.xlu1 %v45_v11 }
  0xab   :  { %v44_v12 = vmul.f32 %v42_v10, %v42_v10 }
  0xad   :  { %v48_v13 = vsel %vm31_vm0, %v44_v12, 0.0 }
  0xae   :  { %49 = vadd.xlane.f32.xlu1 %v48_v13 }
 0x137   :  { %v47_v14 = vpop.xlane.xlu1 %46 }
 0x138   :  { %v52_v15 = vmul.f32 0.032258064, %v47_v14 }
 0x13a   :  { %119 = vrsqrt.f32 %v52_v15  ;;  %vm56_vm1 = vcmp.eq.f32.partialorder %v52_v15, inf  ;;  %v59_v20 = vand.u32 2147483648, %v52_v15  ;;  %vm58_vm2 = vcmp.eq.f32.partialorder %v52_v15, 0.0 }
 0x13b   :  { %v50_v16 = vpop.xlane.xlu1 %49 }
 0x13c   :  { %v53_v17 = vmul.f32 0.032258064, %v50_v16 }
 0x13e   :  { %121 = vrsqrt.f32 %v53_v17  ;;  %vm63_vm3 = vcmp.eq.f32.partialorder %v53_v17, inf  ;;  %v66_v26 = vand.u32 2147483648, %v53_v17  ;;  %vm65_vm4 = vcmp.eq.f32.partialorder %v53_v17, 0.0 }
 0x144   :  { %v120_v18 = vpop.eup %119 }
 0x145   :  { %v55_v19 = vmul.f32 %v120_v18, %v52_v15 }
 0x147   :  { %v57_v21 = vsel %vm56_vm1, %v52_v15, %v55_v19 }
 0x148   :  { %v122_v22 = vpop.eup %121  ;;  %v60_v23 = vsel %vm58_vm2, %v59_v20, %v57_v21 }
 0x149   :  { %v68_v24 = vadd.f32 1e-06, %v60_v23  ;;  %v62_v25 = vmul.f32 %v122_v22, %v53_v17 }
 0x14b   :  { %123 = vrcp.f32 %v68_v24  ;;  %v64_v27 = vsel %vm63_vm3, %v53_v17, %v62_v25 }
 0x14c   :  { %v67_v28 = vsel %vm65_vm4, %v66_v26, %v64_v27 }
 0x14d   :  { %v69_v29 = vadd.f32 1e-06, %v67_v28 }
 0x14f   :  { %125 = vrcp.f32 %v69_v29 }
 0x155   :  { %v124_v30 = vpop.eup %123 }
 0x156   :  { %v74_v32 = vmul.f32 %v124_v30, %v41_v6 }
 0x158   :  { %v83_v34 = vmul.f32 %v113_v31, %v74_v32 }
 0x159   :  { %v126_v35 = vpop.eup %125 }
 0x15a   :  { %v75_v36 = vmul.f32 %v126_v35, %v42_v10  ;;  %v92_v37 = vadd.f32 %v114_v33, %v83_v34 }
 0x15c   :  { %v84_v38 = vmul.f32 %v113_v31, %v75_v36  ;;  %94 = vst.msk [vmem:[#allocation5] sm:$0xff] %vm31_vm0, %v92_v37 }
 0x15e   :  { %v93_v39 = vadd.f32 %v114_v33, %v84_v38 }
 0x160   :  { %95 = vst.msk [vmem:[#allocation5 + $0x8] sm:$0xff] %vm31_vm0, %v93_v39 }
 0x161   :  { %160 = shalt.err (!%p157_p12)
}
 0x162   :  { %s161_s5 = scalar_lea.hbm %s244_s3, 256 }
 0x163   :  { %p162_p13 = scmp.ne.s32.totalorder %s244_s3, %s161_s5  ;;  %p165_p0 = scmp.lt.u32.totalorder %s161_s5, %s244_s3 }
 0x165   :  { %p167_p1 = pnand %p165_p0, %p162_p13 }
 0x167   :  { %170 = shalt.err (!%p167_p1)
}
 0x168   :  { %107 = dma.vmem_to_hbm [thread:$0]  %s102_s30, 256, %s244_s3, [#allocation4], %s176_s22, %s176_s22, %s177_s23  }
 0x169   :  { %173 = dma.done.wait [#allocation4], 256  }
 0x16a   :  { %174 = vsyncadd [#allocation4], 4294967040 }
 0x16b   :  { %111 = vsyncpa [#allocation3], 1 }
 0x16c   :  { %112 = vsyncpa [#allocation4], 1 }

</bundles_post_ra>
